<compile_context>
chip_gen: v6e
topology: v6e:2x2x1
jax: 0.10.0
libtpu: 0.0.40
codegen_flags: <defaults>
</compile_context>

<pallas_src>
import math

import numpy as np
import jax
import jax.numpy as jnp
from jax.experimental import pallas as pl
from jax.experimental.pallas import tpu as pltpu


def _geoconv_kernel(edge_ref, pd_ref, xc_ref, we_ref, s1_ref,
                    wo1_ref, wo2_ref, s2_ref, out_ref):
    f32 = jnp.float32
    edge = edge_ref[...].astype(f32)              # (C, k, TM)  bf16 -> f32
    pd = pd_ref[...].astype(f32)                  # (3, k, TM)
    pd0, pd1, pd2 = pd[0], pd[1], pd[2]           # (k, TM) — points on lanes

    # ---- geometry, lane-dense --------------------------------------------
    sq = jnp.maximum(pd0 * pd0 + pd1 * pd1 + pd2 * pd2, 1e-32)
    inv = jax.lax.rsqrt(sq)                       # 1 / clamp(|p_diff|, 1e-16)
    p_dis = sq * inv                              # clamp(|p_diff|, 1e-16)
    p_r = jnp.max(p_dis, axis=0, keepdims=True) * 1.1          # (1, TM)
    p_d = (p_r - p_dis) ** 2                                    # (k, TM)
    wgt = p_d * pl.reciprocal(jnp.sum(p_d, axis=0, keepdims=True), approx=True)

    # ---- per-direction cos^2 * radial weights, folded onto edge ----------
    # cos^2(u), |u| <= 1, even Taylor through u^10 (max err < 5e-6).
    blocks = []
    for pda in (pd0, pd1, pd2):
        u = pda * inv
        v = u * u
        cos2 = 1.0 + v * (-1.0 + v * (1.0 / 3.0 + v * (-2.0 / 45.0
                 + v * (1.0 / 315.0 + v * (-2.0 / 14175.0)))))
        c = cos2 * wgt                                          # (k, TM)
        c_hi = jnp.where(pda > 0, c, 0.0)
        c_lo = c - c_hi
        for cg in (c_lo, c_hi):                  # order matches torch lins:
            blocks.append(edge * cg[None])       # (C, k, TM)   [lo, hi] / axis
            blocks.append(cg[None])              # (1, k, TM)   bias channel
    ew = jnp.concatenate(blocks, axis=0)         # (6*(C+1), k, TM)
    e_cat = ew.reshape(ew.shape[0] * ew.shape[1], ew.shape[2])  # (K, TM)

    # ---- fused 6-way linear (+bias), BN1 folded; neighbor sum on the MXU --
    y = jnp.dot(we_ref[...], e_cat, preferred_element_type=f32) + s1_ref[...]
    y = jnp.maximum(y, 0.0)                                     # (H, TM)

    # ---- lin1(center) + lin2(hidden), BN2 folded; split dots (no concat) --
    out = (jnp.dot(wo1_ref[...], xc_ref[...], preferred_element_type=f32)
           + jnp.dot(wo2_ref[...], y, preferred_element_type=f32)
           + s2_ref[...])
    out_ref[...] = jnp.maximum(out, 0.0).astype(out_ref.dtype)  # (O, TM)


def geoconv_pallas(x, p, sid, tid, B, n, params, *, tile_m=512, eps=1e-5):
    N, C = x.shape
    E = sid.shape[0]
    M = B * n
    k = E // M
    assert E == M * k
    H = params["Wl"].shape[-1]
    O = params["W1"].shape[-1]

    f32 = jnp.float32
    bf16 = jnp.bfloat16

    # ---- tiling: lane dim = points, tile_m multiple of 128, exact grid ----
    # (pad M up to a 128 multiple and crop after; never shrink to lane-sparse
    # tiles).  v7x note: keep grid >= 2 (ideally >= 8) steps for 2 TCs.
    q = -(-M // 128)                               # 128-lane groups
    t_req = max(1, min(tile_m, q * 128) // 128)
    t = 1
    for d in range(t_req, 0, -1):
        if q % d == 0:
            t = d
            break
    tile_m = t * 128
    m_pad = q * 128
    grid = (q // t,)

    # ---- glue (XLA): channel-major gathers straight into kernel layout ----
    # Transposing the (tiny) index arrays instead of the gathered edge tensor
    # removes the (E, C) -> (C, k, M) full-HBM transpose round trip.
    sid_mk = sid.reshape(M, k)
    tid_mk = tid.reshape(M, k)
    if m_pad != M:
        zpad = jnp.zeros((m_pad - M, k), sid.dtype)
        sid_mk = jnp.concatenate([sid_mk, zpad], axis=0)
        tid_mk = jnp.concatenate([tid_mk, zpad], axis=0)
    sid_t = sid_mk.T.reshape(-1)                   # (k*m_pad,)  kk-major
    tid_t = tid_mk.T.reshape(-1)
    xT = x.astype(f32).T                           # (C, N)  tiny
    pT = p.astype(f32).T                           # (3, N)  tiny
    edge_t = (xT[:, sid_t] - xT[:, tid_t]).reshape(C, k, m_pad).astype(bf16)
    pd_t = (pT[:, sid_t] - pT[:, tid_t]).reshape(3, k, m_pad).astype(bf16)
    xc_t = xT[:, tid_mk[:, 0]]                     # (C, m_pad)  f32 centers

    # ---- fold parameters: 6 linears + biases + eval-mode BN1/BN2 ----------
    Wl = params["Wl"].astype(f32)                  # (6, C, H)
    bl = params["bl"].astype(f32)                  # (6, H)
    W1 = params["W1"].astype(f32)                  # (C, O)
    W2 = params["W2"].astype(f32)                  # (H, O)
    b1 = params["b1"].astype(f32)
    b2 = params["b2"].astype(f32)
    g1, be1, mu1, v1 = [params["bn1"][r].astype(f32) for r in range(4)]
    g2, be2, mu2, v2 = [params["bn2"][r].astype(f32) for r in range(4)]
    sc1 = g1 * jax.lax.rsqrt(v1 + eps)
    sh1 = be1 - mu1 * sc1
    sc2 = g2 * jax.lax.rsqrt(v2 + eps)
    sh2 = be2 - mu2 * sc2

    # Per-direction weights (+ bias row), replicated along k so the single MXU
    # dot also performs the neighbor reduction.  Row r = (j*(C+1)+c)*k + kk.
    Wfull = jnp.concatenate([Wl, bl[:, None, :]], axis=1)       # (6, C+1, H)
    We = jnp.broadcast_to(Wfull[:, :, None, :], (6, C + 1, k, H))
    We = We.reshape(6 * (C + 1) * k, H)
    We_t = (We * sc1[None, :]).T                                # (H, K)
    s1 = sh1.reshape(H, 1)

    Wo1 = W1.T * sc2[:, None]                                   # (O, C)
    Wo2 = W2.T * sc2[:, None]                                   # (O, H)
    s2 = (sc2 * (b1 + b2) + sh2).reshape(O, 1)

    K = 6 * (C + 1) * k
    out_t = pl.pallas_call(
        _geoconv_kernel,
        out_shape=jax.ShapeDtypeStruct((O, m_pad), f32),
        grid=grid,
        in_specs=[
            pl.BlockSpec((C, k, tile_m), lambda i: (0, 0, i)),  # edge (bf16)
            pl.BlockSpec((3, k, tile_m), lambda i: (0, 0, i)),  # pd   (bf16)
            pl.BlockSpec((C, tile_m), lambda i: (0, i)),        # centers
            pl.BlockSpec((H, K), lambda i: (0, 0)),             # fused We
            pl.BlockSpec((H, 1), lambda i: (0, 0)),             # BN1 shift
            pl.BlockSpec((O, C), lambda i: (0, 0)),             # lin1 (folded)
            pl.BlockSpec((O, H), lambda i: (0, 0)),             # lin2 (folded)
            pl.BlockSpec((O, 1), lambda i: (0, 0)),             # BN2 shift
        ],
        out_specs=pl.BlockSpec((O, tile_m), lambda i: (0, i)),
        compiler_params=pltpu.CompilerParams(
            dimension_semantics=("parallel",),
            # comfortably within v7x's 64 MiB; raise toward 64-100 MiB on
            # v5e/v6e if tile_m is pushed to 1024-2048.
            vmem_limit_bytes=48 * 1024 * 1024),
    )(edge_t, pd_t, xc_t, We_t, s1, Wo1, Wo2, s2)
    # Crop the lane padding; final transpose only to match the torch (M, O)
    # contract — drop it if the consumer can take channels-major (O, M).
    return out_t[:, :M].T


def geoconv_ref_np(x, p, sid, tid, B, n, params, eps=1e-5):
    """Straight numpy(float64) port of the torch forward, for validation."""
    x = x.astype(np.float64)
    p = p.astype(np.float64)
    E = sid.shape[0]
    k = E // (B * n)
    Wl = params["Wl"].astype(np.float64)
    bl = params["bl"].astype(np.float64)

    edge = x[sid] - x[tid]
    p_diff = p[sid] - p[tid]
    p_dis = np.maximum(np.linalg.norm(p_diff, axis=-1, keepdims=True), 1e-16)
    p_cos = np.cos(p_diff / p_dis) ** 2
    bid = (p_diff > 0).astype(np.int64) + np.array([0, 2, 4])
    h = np.stack([edge @ Wl[j] + bl[j] for j in range(6)])            # (6,E,H)
    sel = np.stack([h[bid[:, i], np.arange(E)] for i in range(3)])    # (3,E,H)
    sel = sel * p_cos.T[:, :, None]
    e = sel.sum(0).reshape(B, n, k, -1)
    p_dis = p_dis.reshape(B, n, k, 1)
    p_r = p_dis.max(axis=2, keepdims=True) * 1.1
    p_d = (p_r - p_dis) ** 2
    e = e * p_d / p_d.sum(axis=2, keepdims=True)
    y = e.sum(axis=2)                                                 # (B,n,H)

    g, bta, mu, var = params["bn1"].astype(np.float64)
    y = (y - mu) / np.sqrt(var + eps) * g + bta
    y = np.maximum(y, 0.0)

    xc = x[tid[::k]] @ params["W1"].astype(np.float64) + params["b1"].astype(np.float64)
    y = xc.reshape(B, n, -1) + y @ params["W2"].astype(np.float64) \
        + params["b2"].astype(np.float64)

    g, bta, mu, var = params["bn2"].astype(np.float64)
    y = (y - mu) / np.sqrt(var + eps) * g + bta
    y = np.maximum(y, 0.0)
    return y.reshape(B * n, -1)


if __name__ == "__main__":
    B, n, k = 2, 16, 8
    C_in, H, O = 4, 32, 32
    N = B * n
    E = N * k

    key = jax.random.PRNGKey(0)
    keys = jax.random.split(key, 20)

    x = jax.random.normal(keys[0], (N, C_in), jnp.float32)
    p = jax.random.uniform(keys[1], (N, 3), jnp.float32)
    sid = jax.random.randint(keys[2], (E,), 0, N, dtype=jnp.int32)
    tid = jnp.repeat(jnp.arange(N, dtype=jnp.int32), k)

    # node-major grouping assumption used by x[tid[::k]]
    tid_np = np.asarray(tid).reshape(N, k)
    assert (tid_np == tid_np[:, :1]).all()

    def lin_init(kw, kb, fan_in, fan_out):
        bound = 1.0 / math.sqrt(fan_in)
        W = jax.random.uniform(kw, (fan_in, fan_out), jnp.float32, -bound, bound)
        b = jax.random.uniform(kb, (fan_out,), jnp.float32, -bound, bound)
        return W, b

    Wl_list, bl_list = [], []
    for j in range(6):
        W, b = lin_init(keys[3 + 2 * j], keys[4 + 2 * j], C_in, H)
        Wl_list.append(W)
        bl_list.append(b)
    W1, b1 = lin_init(keys[15], keys[16], C_in, O)
    W2, b2 = lin_init(keys[17], keys[18], H, O)

    params = dict(
        Wl=jnp.stack(Wl_list),                 # (6, C_in, H)
        bl=jnp.stack(bl_list),                 # (6, H)
        W1=W1, b1=b1, W2=W2, b2=b2,
        bn1=jnp.stack([jnp.ones(H), jnp.zeros(H),
                       jnp.zeros(H), jnp.ones(H)]).astype(jnp.float32),
        bn2=jnp.stack([jnp.ones(O), jnp.zeros(O),
                       jnp.zeros(O), jnp.ones(O)]).astype(jnp.float32),
    )

    out = geoconv_pallas(x, p, sid, tid, B, n, params)
    out = jax.block_until_ready(out)

    ref = geoconv_ref_np(np.asarray(x), np.asarray(p), np.asarray(sid),
                         np.asarray(tid), B, n,
                         {kk: np.asarray(v) for kk, v in params.items()})
    assert out.shape == (B * n, O)
    assert np.allclose(np.asarray(out), ref, rtol=2e-2, atol=2e-2), \
        float(np.max(np.abs(np.asarray(out) - ref)))
    print("KERNEL_OK")
</pallas_src>

<mosaic_0001>
module attributes {stable_mosaic.version = 11 : i64} {
  func.func @_geoconv_kernel(%arg0: i32, %arg1: memref<4x8x128xbf16, #tpu.memory_space<vmem>>, %arg2: memref<3x8x128xbf16, #tpu.memory_space<vmem>>, %arg3: memref<4x128xf32, #tpu.memory_space<vmem>>, %arg4: memref<32x240xf32, #tpu.memory_space<vmem>>, %arg5: memref<32x1xf32, #tpu.memory_space<vmem>>, %arg6: memref<32x4xf32, #tpu.memory_space<vmem>>, %arg7: memref<32x32xf32, #tpu.memory_space<vmem>>, %arg8: memref<32x1xf32, #tpu.memory_space<vmem>>, %arg9: memref<32x128xf32, #tpu.memory_space<vmem>>) attributes {dimension_semantics = [#tpu.dimension_semantics<parallel>], iteration_bounds = array<i64: 1>, scalar_prefetch = 0 : i64, scratch_operands = 0 : i64, tpu.core_type = #tpu.core_type<tc>, window_params = [{transform_indices = @transform_0, window_bounds = array<i64: 4, 8, 128>}, {transform_indices = @transform_1, window_bounds = array<i64: 3, 8, 128>}, {transform_indices = @transform_2, window_bounds = array<i64: 4, 128>}, {pipeline_mode = #tpu.pipeline_mode<synchronous>, transform_indices = @transform_3, window_bounds = array<i64: 32, 240>}, {pipeline_mode = #tpu.pipeline_mode<synchronous>, transform_indices = @transform_4, window_bounds = array<i64: 32, 1>}, {pipeline_mode = #tpu.pipeline_mode<synchronous>, transform_indices = @transform_5, window_bounds = array<i64: 32, 4>}, {pipeline_mode = #tpu.pipeline_mode<synchronous>, transform_indices = @transform_6, window_bounds = array<i64: 32, 32>}, {pipeline_mode = #tpu.pipeline_mode<synchronous>, transform_indices = @transform_7, window_bounds = array<i64: 32, 1>}, {transform_indices = @transform_8, window_bounds = array<i64: 32, 128>}]} {
    %c0 = arith.constant 0 : index
    %c0_0 = arith.constant 0 : index
    %c0_1 = arith.constant 0 : index
    %0 = vector.load %arg1[%c0, %c0_0, %c0_1] : memref<4x8x128xbf16, #tpu.memory_space<vmem>>, vector<4x8x128xbf16>
    %1 = arith.extf %0 : vector<4x8x128xbf16> to vector<4x8x128xf32>
    %c0_2 = arith.constant 0 : index
    %c0_3 = arith.constant 0 : index
    %c0_4 = arith.constant 0 : index
    %2 = vector.load %arg2[%c0_2, %c0_3, %c0_4] : memref<3x8x128xbf16, #tpu.memory_space<vmem>>, vector<3x8x128xbf16>
    %3 = arith.extf %2 : vector<3x8x128xbf16> to vector<3x8x128xf32>
    %4 = vector.extract_strided_slice %3 {offsets = [0, 0, 0], sizes = [1, 8, 128], strides = [1, 1, 1]} : vector<3x8x128xf32> to vector<1x8x128xf32>
    %5 = vector.shape_cast %4 : vector<1x8x128xf32> to vector<8x128xf32>
    %6 = vector.extract_strided_slice %3 {offsets = [1, 0, 0], sizes = [1, 8, 128], strides = [1, 1, 1]} : vector<3x8x128xf32> to vector<1x8x128xf32>
    %7 = vector.shape_cast %6 : vector<1x8x128xf32> to vector<8x128xf32>
    %8 = vector.extract_strided_slice %3 {offsets = [2, 0, 0], sizes = [1, 8, 128], strides = [1, 1, 1]} : vector<3x8x128xf32> to vector<1x8x128xf32>
    %9 = vector.shape_cast %8 : vector<1x8x128xf32> to vector<8x128xf32>
    %10 = arith.mulf %5, %5 : vector<8x128xf32>
    %11 = arith.mulf %7, %7 : vector<8x128xf32>
    %12 = arith.addf %10, %11 : vector<8x128xf32>
    %13 = arith.mulf %9, %9 : vector<8x128xf32>
    %14 = arith.addf %12, %13 : vector<8x128xf32>
    %cst = arith.constant 1.000000e-32 : f32
    %15 = vector.broadcast %cst : f32 to vector<8x128xf32>
    %16 = arith.maximumf %14, %15 : vector<8x128xf32>
    %17 = math.rsqrt %16 : vector<8x128xf32>
    %18 = arith.mulf %16, %17 : vector<8x128xf32>
    %cst_5 = arith.constant dense<0xFF800000> : vector<128xf32>
    %19 = vector.multi_reduction <maximumf>, %18, %cst_5 [0] : vector<8x128xf32> to vector<128xf32>
    %20 = vector.shape_cast %19 : vector<128xf32> to vector<1x128xf32>
    %cst_6 = arith.constant 1.100000e+00 : f32
    %21 = vector.broadcast %cst_6 : f32 to vector<1x128xf32>
    %22 = arith.mulf %20, %21 : vector<1x128xf32>
    %23 = vector.broadcast %22 : vector<1x128xf32> to vector<8x128xf32>
    %24 = arith.subf %23, %18 : vector<8x128xf32>
    %25 = arith.mulf %24, %24 : vector<8x128xf32>
    %cst_7 = arith.constant dense<0.000000e+00> : vector<128xf32>
    %26 = vector.multi_reduction <add>, %25, %cst_7 [0] : vector<8x128xf32> to vector<128xf32>
    %27 = vector.shape_cast %26 : vector<128xf32> to vector<1x128xf32>
    %28 = tpu.reciprocal %27 {approx = true} : vector<1x128xf32> -> vector<1x128xf32>
    %29 = vector.broadcast %28 : vector<1x128xf32> to vector<8x128xf32>
    %30 = arith.mulf %25, %29 : vector<8x128xf32>
    %31 = arith.mulf %5, %17 : vector<8x128xf32>
    %32 = arith.mulf %31, %31 : vector<8x128xf32>
    %cst_8 = arith.constant -1.41093478E-4 : f32
    %33 = vector.broadcast %cst_8 : f32 to vector<8x128xf32>
    %34 = arith.mulf %32, %33 : vector<8x128xf32>
    %cst_9 = arith.constant 0.00317460322 : f32
    %35 = vector.broadcast %cst_9 : f32 to vector<8x128xf32>
    %36 = arith.addf %35, %34 : vector<8x128xf32>
    %37 = arith.mulf %32, %36 : vector<8x128xf32>
    %cst_10 = arith.constant -0.0444444455 : f32
    %38 = vector.broadcast %cst_10 : f32 to vector<8x128xf32>
    %39 = arith.addf %38, %37 : vector<8x128xf32>
    %40 = arith.mulf %32, %39 : vector<8x128xf32>
    %cst_11 = arith.constant 0.333333343 : f32
    %41 = vector.broadcast %cst_11 : f32 to vector<8x128xf32>
    %42 = arith.addf %41, %40 : vector<8x128xf32>
    %43 = arith.mulf %32, %42 : vector<8x128xf32>
    %cst_12 = arith.constant -1.000000e+00 : f32
    %44 = vector.broadcast %cst_12 : f32 to vector<8x128xf32>
    %45 = arith.addf %44, %43 : vector<8x128xf32>
    %46 = arith.mulf %32, %45 : vector<8x128xf32>
    %cst_13 = arith.constant 1.000000e+00 : f32
    %47 = vector.broadcast %cst_13 : f32 to vector<8x128xf32>
    %48 = arith.addf %47, %46 : vector<8x128xf32>
    %49 = arith.mulf %48, %30 : vector<8x128xf32>
    %cst_14 = arith.constant 0.000000e+00 : f32
    %50 = vector.broadcast %cst_14 : f32 to vector<8x128xf32>
    %51 = arith.cmpf ogt, %5, %50 : vector<8x128xf32>
    %cst_15 = arith.constant 0.000000e+00 : f32
    %52 = vector.broadcast %cst_15 : f32 to vector<8x128xf32>
    %53 = arith.select %51, %49, %52 : vector<8x128xi1>, vector<8x128xf32>
    %54 = arith.subf %49, %53 : vector<8x128xf32>
    %55 = vector.shape_cast %54 : vector<8x128xf32> to vector<1x8x128xf32>
    %56 = vector.broadcast %55 : vector<1x8x128xf32> to vector<4x8x128xf32>
    %57 = arith.mulf %1, %56 : vector<4x8x128xf32>
    %58 = vector.shape_cast %54 : vector<8x128xf32> to vector<1x8x128xf32>
    %59 = vector.shape_cast %53 : vector<8x128xf32> to vector<1x8x128xf32>
    %60 = vector.broadcast %59 : vector<1x8x128xf32> to vector<4x8x128xf32>
    %61 = arith.mulf %1, %60 : vector<4x8x128xf32>
    %62 = vector.shape_cast %53 : vector<8x128xf32> to vector<1x8x128xf32>
    %63 = arith.mulf %7, %17 : vector<8x128xf32>
    %64 = arith.mulf %63, %63 : vector<8x128xf32>
    %cst_16 = arith.constant -1.41093478E-4 : f32
    %65 = vector.broadcast %cst_16 : f32 to vector<8x128xf32>
    %66 = arith.mulf %64, %65 : vector<8x128xf32>
    %cst_17 = arith.constant 0.00317460322 : f32
    %67 = vector.broadcast %cst_17 : f32 to vector<8x128xf32>
    %68 = arith.addf %67, %66 : vector<8x128xf32>
    %69 = arith.mulf %64, %68 : vector<8x128xf32>
    %cst_18 = arith.constant -0.0444444455 : f32
    %70 = vector.broadcast %cst_18 : f32 to vector<8x128xf32>
    %71 = arith.addf %70, %69 : vector<8x128xf32>
    %72 = arith.mulf %64, %71 : vector<8x128xf32>
    %cst_19 = arith.constant 0.333333343 : f32
    %73 = vector.broadcast %cst_19 : f32 to vector<8x128xf32>
    %74 = arith.addf %73, %72 : vector<8x128xf32>
    %75 = arith.mulf %64, %74 : vector<8x128xf32>
    %cst_20 = arith.constant -1.000000e+00 : f32
    %76 = vector.broadcast %cst_20 : f32 to vector<8x128xf32>
    %77 = arith.addf %76, %75 : vector<8x128xf32>
    %78 = arith.mulf %64, %77 : vector<8x128xf32>
    %cst_21 = arith.constant 1.000000e+00 : f32
    %79 = vector.broadcast %cst_21 : f32 to vector<8x128xf32>
    %80 = arith.addf %79, %78 : vector<8x128xf32>
    %81 = arith.mulf %80, %30 : vector<8x128xf32>
    %cst_22 = arith.constant 0.000000e+00 : f32
    %82 = vector.broadcast %cst_22 : f32 to vector<8x128xf32>
    %83 = arith.cmpf ogt, %7, %82 : vector<8x128xf32>
    %cst_23 = arith.constant 0.000000e+00 : f32
    %84 = vector.broadcast %cst_23 : f32 to vector<8x128xf32>
    %85 = arith.select %83, %81, %84 : vector<8x128xi1>, vector<8x128xf32>
    %86 = arith.subf %81, %85 : vector<8x128xf32>
    %87 = vector.shape_cast %86 : vector<8x128xf32> to vector<1x8x128xf32>
    %88 = vector.broadcast %87 : vector<1x8x128xf32> to vector<4x8x128xf32>
    %89 = arith.mulf %1, %88 : vector<4x8x128xf32>
    %90 = vector.shape_cast %86 : vector<8x128xf32> to vector<1x8x128xf32>
    %91 = vector.shape_cast %85 : vector<8x128xf32> to vector<1x8x128xf32>
    %92 = vector.broadcast %91 : vector<1x8x128xf32> to vector<4x8x128xf32>
    %93 = arith.mulf %1, %92 : vector<4x8x128xf32>
    %94 = vector.shape_cast %85 : vector<8x128xf32> to vector<1x8x128xf32>
    %95 = arith.mulf %9, %17 : vector<8x128xf32>
    %96 = arith.mulf %95, %95 : vector<8x128xf32>
    %cst_24 = arith.constant -1.41093478E-4 : f32
    %97 = vector.broadcast %cst_24 : f32 to vector<8x128xf32>
    %98 = arith.mulf %96, %97 : vector<8x128xf32>
    %cst_25 = arith.constant 0.00317460322 : f32
    %99 = vector.broadcast %cst_25 : f32 to vector<8x128xf32>
    %100 = arith.addf %99, %98 : vector<8x128xf32>
    %101 = arith.mulf %96, %100 : vector<8x128xf32>
    %cst_26 = arith.constant -0.0444444455 : f32
    %102 = vector.broadcast %cst_26 : f32 to vector<8x128xf32>
    %103 = arith.addf %102, %101 : vector<8x128xf32>
    %104 = arith.mulf %96, %103 : vector<8x128xf32>
    %cst_27 = arith.constant 0.333333343 : f32
    %105 = vector.broadcast %cst_27 : f32 to vector<8x128xf32>
    %106 = arith.addf %105, %104 : vector<8x128xf32>
    %107 = arith.mulf %96, %106 : vector<8x128xf32>
    %cst_28 = arith.constant -1.000000e+00 : f32
    %108 = vector.broadcast %cst_28 : f32 to vector<8x128xf32>
    %109 = arith.addf %108, %107 : vector<8x128xf32>
    %110 = arith.mulf %96, %109 : vector<8x128xf32>
    %cst_29 = arith.constant 1.000000e+00 : f32
    %111 = vector.broadcast %cst_29 : f32 to vector<8x128xf32>
    %112 = arith.addf %111, %110 : vector<8x128xf32>
    %113 = arith.mulf %112, %30 : vector<8x128xf32>
    %cst_30 = arith.constant 0.000000e+00 : f32
    %114 = vector.broadcast %cst_30 : f32 to vector<8x128xf32>
    %115 = arith.cmpf ogt, %9, %114 : vector<8x128xf32>
    %cst_31 = arith.constant 0.000000e+00 : f32
    %116 = vector.broadcast %cst_31 : f32 to vector<8x128xf32>
    %117 = arith.select %115, %113, %116 : vector<8x128xi1>, vector<8x128xf32>
    %118 = arith.subf %113, %117 : vector<8x128xf32>
    %119 = vector.shape_cast %118 : vector<8x128xf32> to vector<1x8x128xf32>
    %120 = vector.broadcast %119 : vector<1x8x128xf32> to vector<4x8x128xf32>
    %121 = arith.mulf %1, %120 : vector<4x8x128xf32>
    %122 = vector.shape_cast %118 : vector<8x128xf32> to vector<1x8x128xf32>
    %123 = vector.shape_cast %117 : vector<8x128xf32> to vector<1x8x128xf32>
    %124 = vector.broadcast %123 : vector<1x8x128xf32> to vector<4x8x128xf32>
    %125 = arith.mulf %1, %124 : vector<4x8x128xf32>
    %126 = vector.shape_cast %117 : vector<8x128xf32> to vector<1x8x128xf32>
    %127 = tpu.concatenate %57, %58, %61, %62, %89, %90, %93, %94, %121, %122, %125, %126 in 0 : vector<4x8x128xf32>, vector<1x8x128xf32>, vector<4x8x128xf32>, vector<1x8x128xf32>, vector<4x8x128xf32>, vector<1x8x128xf32>, vector<4x8x128xf32>, vector<1x8x128xf32>, vector<4x8x128xf32>, vector<1x8x128xf32>, vector<4x8x128xf32>, vector<1x8x128xf32> -> vector<30x8x128xf32>
    %128 = vector.shape_cast %127 : vector<30x8x128xf32> to vector<240x128xf32>
    %c0_32 = arith.constant 0 : index
    %c0_33 = arith.constant 0 : index
    %129 = vector.load %arg4[%c0_32, %c0_33] : memref<32x240xf32, #tpu.memory_space<vmem>>, vector<32x240xf32>
    %cst_34 = arith.constant dense<0.000000e+00> : vector<32x128xf32>
    %130 = tpu.matmul %129, %128, %cst_34 {dimension_numbers = #tpu.dot_dimension_numbers<[1], [0], [0], [1], [0, 0, 1, 1], [], []>} : vector<32x240xf32>, vector<240x128xf32>, vector<32x128xf32> -> vector<32x128xf32>
    %c0_35 = arith.constant 0 : index
    %c0_36 = arith.constant 0 : index
    %131 = vector.load %arg5[%c0_35, %c0_36] : memref<32x1xf32, #tpu.memory_space<vmem>>, vector<32x1xf32>
    %132 = vector.broadcast %131 : vector<32x1xf32> to vector<32x128xf32>
    %133 = arith.addf %130, %132 : vector<32x128xf32>
    %cst_37 = arith.constant 0.000000e+00 : f32
    %134 = vector.broadcast %cst_37 : f32 to vector<32x128xf32>
    %135 = arith.maximumf %133, %134 : vector<32x128xf32>
    %c0_38 = arith.constant 0 : index
    %c0_39 = arith.constant 0 : index
    %136 = vector.load %arg6[%c0_38, %c0_39] : memref<32x4xf32, #tpu.memory_space<vmem>>, vector<32x4xf32>
    %c0_40 = arith.constant 0 : index
    %c0_41 = arith.constant 0 : index
    %137 = vector.load %arg3[%c0_40, %c0_41] : memref<4x128xf32, #tpu.memory_space<vmem>>, vector<4x128xf32>
    %cst_42 = arith.constant dense<0.000000e+00> : vector<32x128xf32>
    %138 = tpu.matmul %136, %137, %cst_42 {dimension_numbers = #tpu.dot_dimension_numbers<[1], [0], [0], [1], [0, 0, 1, 1], [], []>} : vector<32x4xf32>, vector<4x128xf32>, vector<32x128xf32> -> vector<32x128xf32>
    %c0_43 = arith.constant 0 : index
    %c0_44 = arith.constant 0 : index
    %139 = vector.load %arg7[%c0_43, %c0_44] : memref<32x32xf32, #tpu.memory_space<vmem>>, vector<32x32xf32>
    %cst_45 = arith.constant dense<0.000000e+00> : vector<32x128xf32>
    %140 = tpu.matmul %139, %135, %cst_45 {dimension_numbers = #tpu.dot_dimension_numbers<[1], [0], [0], [1], [0, 0, 1, 1], [], []>} : vector<32x32xf32>, vector<32x128xf32>, vector<32x128xf32> -> vector<32x128xf32>
    %141 = arith.addf %138, %140 : vector<32x128xf32>
    %c0_46 = arith.constant 0 : index
    %c0_47 = arith.constant 0 : index
    %142 = vector.load %arg8[%c0_46, %c0_47] : memref<32x1xf32, #tpu.memory_space<vmem>>, vector<32x1xf32>
    %143 = vector.broadcast %142 : vector<32x1xf32> to vector<32x128xf32>
    %144 = arith.addf %141, %143 : vector<32x128xf32>
    %cst_48 = arith.constant 0.000000e+00 : f32
    %145 = vector.broadcast %cst_48 : f32 to vector<32x128xf32>
    %146 = arith.maximumf %144, %145 : vector<32x128xf32>
    %c0_49 = arith.constant 0 : index
    %c0_50 = arith.constant 0 : index
    %147 = vector.load %arg9[%c0_49, %c0_50] : memref<32x128xf32, #tpu.memory_space<vmem>>, vector<32x128xf32>
    tpu.vector_store %arg9[%c0_49, %c0_50], %146 {strides = array<i32>} : memref<32x128xf32, #tpu.memory_space<vmem>>, vector<32x128xf32>,
    return
  }
  func.func @transform_0(%arg0: i32) -> (i32, i32, i32) {
    %c0_i32 = arith.constant 0 : i32
    %c0_i32_0 = arith.constant 0 : i32
    %c0_i32_1 = arith.constant 0 : i32
    return %c0_i32, %c0_i32_0, %arg0 : i32, i32, i32
  }
  func.func @transform_1(%arg0: i32) -> (i32, i32, i32) {
    %c0_i32 = arith.constant 0 : i32
    %c0_i32_0 = arith.constant 0 : i32
    %c0_i32_1 = arith.constant 0 : i32
    return %c0_i32, %c0_i32_0, %arg0 : i32, i32, i32
  }
  func.func @transform_2(%arg0: i32) -> (i32, i32) {
    %c0_i32 = arith.constant 0 : i32
    %c0_i32_0 = arith.constant 0 : i32
    return %c0_i32, %arg0 : i32, i32
  }
  func.func @transform_3(%arg0: i32) -> (i32, i32) {
    %c0_i32 = arith.constant 0 : i32
    %c0_i32_0 = arith.constant 0 : i32
    %c0_i32_1 = arith.constant 0 : i32
    return %c0_i32, %c0_i32_0 : i32, i32
  }
  func.func @transform_4(%arg0: i32) -> (i32, i32) {
    %c0_i32 = arith.constant 0 : i32
    %c0_i32_0 = arith.constant 0 : i32
    %c0_i32_1 = arith.constant 0 : i32
    return %c0_i32, %c0_i32_0 : i32, i32
  }
  func.func @transform_5(%arg0: i32) -> (i32, i32) {
    %c0_i32 = arith.constant 0 : i32
    %c0_i32_0 = arith.constant 0 : i32
    %c0_i32_1 = arith.constant 0 : i32
    return %c0_i32, %c0_i32_0 : i32, i32
  }
  func.func @transform_6(%arg0: i32) -> (i32, i32) {
    %c0_i32 = arith.constant 0 : i32
    %c0_i32_0 = arith.constant 0 : i32
    %c0_i32_1 = arith.constant 0 : i32
    return %c0_i32, %c0_i32_0 : i32, i32
  }
  func.func @transform_7(%arg0: i32) -> (i32, i32) {
    %c0_i32 = arith.constant 0 : i32
    %c0_i32_0 = arith.constant 0 : i32
    %c0_i32_1 = arith.constant 0 : i32
    return %c0_i32, %c0_i32_0 : i32, i32
  }
  func.func @transform_8(%arg0: i32) -> (i32, i32) {
    %c0_i32 = arith.constant 0 : i32
    %c0_i32_0 = arith.constant 0 : i32
    return %c0_i32, %arg0 : i32, i32
  }
}

</mosaic_0001>

<bundles_post_ra>
// kernel: tpu_custom_call.1
= control target key start
LH: loop header
LB: loop body
LE: loop exit
PB: predicated region body
PF: predicated region fallthrough
CT: control target
= control target key end

     0   :  { %13 = vsyncpa [#allocation3], 0  ;;  %s971_s0 = inlined_call_operand.hbm [shape: bf16[4,8,128], index: 0, kind: input, shape index: {}]   ;;  %s972_s1 = inlined_call_operand.hbm [shape: bf16[3,8,128], index: 1, kind: input, shape index: {}]   ;;  %s973_s2 = inlined_call_operand.vmem [shape: f32[4,128], index: 2, kind: input, shape index: {}]   ;;  %s974_s3 = inlined_call_operand.vmem [shape: f32[32,240], index: 3, kind: input, shape index: {}]   ;;  %s975_s4 = inlined_call_operand.vmem [shape: f32[32,1], index: 4, kind: input, shape index: {}]   ;;  %s976_s5 = inlined_call_operand.vmem [shape: f32[32,4], index: 5, kind: input, shape index: {}]   ;;  %s977_s6 = inlined_call_operand.vmem [shape: f32[32,32], index: 6, kind: input, shape index: {}]   ;;  %s978_s7 = inlined_call_operand.vmem [shape: f32[32,1], index: 7, kind: input, shape index: {}]   ;;  %s979_s8 = inlined_call_operand.hbm [shape: f32[32,128], index: 8, kind: output, shape index: {}]  }
   0x1   :  { %14 = vsyncpa [#allocation6], 0 }
   0x2   :  { %15 = vsyncpa [#allocation4], 0  ;;  %s711_s27 = smov [#allocation2]  }
   0x3   :  { %s21_s28 = sshll.u32 %s711_s27, 4  ;;  %s22_s28 = int_to_ptr.vmem [resolvable:$true] %s21_s28 }
   0x4   :  { %s653_s29 = scalar_lea.vmem %s22_s28, 256  ;;  %p658_p1 = scmp.lt.s32.totalorder %s22_s28, %s22_s28 }
   0x5   :  { %p654_p0 = scmp.ne.s32.totalorder %s22_s28, %s653_s29  ;;  %p659_p2 = scmp.lt.s32.totalorder %s653_s29, %s653_s29 }
   0x7   :  { %p660_p3 = por %p659_p2, %p658_p1 }
   0x9   :  { %p661_p4 = pnand %p660_p3, %p654_p0 }
   0xb   :  { %664 = shalt.err (!%p661_p4)
}
   0xc   :  { %s712_s30 = smov 64   ;;  %s713_s9 = smov 4  }
   0xd   :  { %27 = dma.hbm_to_vmem [thread:$0]  %s971_s0, 256, %s22_s28, [#allocation3], %s712_s30, %s712_s30, %s713_s9  }
   0xe   :  { %s714_s12 = smov [#allocation5]  }
   0xf   :  { %s33_s13 = sshll.u32 %s714_s12, 4  ;;  %s34_s13 = int_to_ptr.vmem [resolvable:$true] %s33_s13 }
  0x10   :  { %s673_s14 = scalar_lea.vmem %s34_s13, 192  ;;  %p678_p6 = scmp.lt.s32.totalorder %s34_s13, %s34_s13 }
  0x11   :  { %p674_p5 = scmp.ne.s32.totalorder %s34_s13, %s673_s14  ;;  %p679_p7 = scmp.lt.s32.totalorder %s673_s14, %s673_s14 }
  0x13   :  { %p680_p8 = por %p679_p7, %p678_p6 }
  0x15   :  { %p681_p9 = pnand %p680_p8, %p674_p5 }
  0x17   :  { %684 = shalt.err (!%p681_p9)
}
  0x18   :  { %39 = dma.hbm_to_vmem [thread:$0]  %s972_s1, 192, %s34_s13, [#allocation6], %s712_s30, %s712_s30, %s713_s9  }
  0x19   :  { %705 = dma.done.wait [#allocation3], 256  }
  0x1a   :  { %706 = vsyncadd [#allocation3], 4294967040 }
  0x1b   :  { %707 = dma.done.wait [#allocation6], 192  }
  0x1c   :  { %708 = vsyncadd [#allocation6], 4294967104  ;;  %v715_v0 = vmov 0.0   ;;  %v591_v1 = vld [vmem:[#allocation5] sm:$0xff]   ;;  %v68_v2 = vld [vmem:[#allocation5 + $0x8] sm:$0xf] }
  0x1d   :  { %214 = vmatprep.subr.mxu0 %v715_v0  ;;  %v772_v3 = vunpack.c.l.bf16 %v591_v1  ;;  %v774_v4 = vunpack.c.h.bf16 %v591_v1  ;;  %v776_v5 = vunpack.c.l.bf16 %v68_v2  ;;  %v170_v11 = vld [vmem:[%s974_s3 + $0x8] sm:$0xff]  ;;  %vm201_vm0 = vcmask 916480   ;;  %v180_v14 = vld [vmem:[%s975_s4 + $0x18] sm:$0xff]  ;;  %v177_v17 = vld [vmem:[%s975_s4] sm:$0xff] }
  0x1e   :  { %569 = vmatprep.mubr.msk.f32.mxu0 %vm201_vm0, %v170_v11  ;;  %v178_v13 = vld [vmem:[%s975_s4 + $0x8] sm:$0xff]  ;;  %v716_v15 = vmov 0   ;;  %v179_v18 = vld [vmem:[%s975_s4 + $0x10] sm:$0xff]  ;;  %v512_v23 = vld [vmem:[%s978_s7] sm:$0xff]  ;;  %vm312_vm4 = vcmask 261120   ;;  %vm423_vm5 = vcmask 1043456  }
  0x1f   :  { %v72_v6 = vmul.f32 %v772_v3, %v772_v3  ;;  %v73_v7 = vmul.f32 %v774_v4, %v774_v4  ;;  %v75_v8 = vmul.f32 %v776_v5, %v776_v5  ;;  %640 = vset.pattern.permute.xlu1 %v716_v15  ;;  %639 = vset.pattern.permute.xlu0 %v716_v15  ;;  %v513_v24 = vld [vmem:[%s978_s7 + $0x8] sm:$0xff]  ;;  %v514_v30 = vld [vmem:[%s978_s7 + $0x10] sm:$0xff]  ;;  %v515_v31 = vld [vmem:[%s978_s7 + $0x18] sm:$0xff]  ;;  %vm134_vm1 = vcmp.gt.f32.partialorder %v774_v4, 0.0 }
  0x20   :  { %188 = vperm.xlu1 %640, %v178_v13   ;;  %198 = vperm.xlu0 %639, %v180_v14   ;;  %vm158_vm2 = vcmp.gt.f32.partialorder %v776_v5, 0.0  ;;  %vm110_vm3 = vcmp.gt.f32.partialorder %v772_v3, 0.0  ;;  %vm410_vm6 = vcmask 31744  }
  0x21   :  { %v74_v9 = vadd.f32 %v73_v7, %v72_v6 }
  0x23   :  { %v76_v10 = vadd.f32 %v75_v8, %v74_v9 }
  0x24   :  { %183 = vperm.xlu1 %640, %v177_v17   ;;  %193 = vperm.xlu0 %639, %v179_v18  }
  0x25   :  { %v77_v12 = vmax.f32 %v76_v10, 1e-32  ;;  %v583_v10 = vld [vmem:[#allocation2] sm:$0xff]  }
  0x26   :  { %v815_v17 = vunpack.c.l.bf16 %v583_v10 }
  0x27   :  { %641 = vrsqrt.f32 %v77_v12 }
  0x28   :  { %518 = vperm.xlu0 %639, %v512_v23   ;;  %523 = vperm.xlu1 %640, %v513_v24  }
  0x2c   :  { %528 = vperm.xlu0 %639, %v514_v30   ;;  %533 = vperm.xlu1 %640, %v515_v31  }
  0x34   :  { %v642_v16 = vpop.eup %641 }
  0x35   :  { %v79_v19 = vmul.f32 %v642_v16, %v77_v12  ;;  %v121_v20 = vmul.f32 %v642_v16, %v774_v4  ;;  %v145_v21 = vmul.f32 %v642_v16, %v776_v5  ;;  %v97_v29 = vmul.f32 %v642_v16, %v772_v3  ;;  %v594_v16 = vld [vmem:[#allocation2 + $0x8] sm:$0xff]   ;;  %v172_v4 = vld [vmem:[%s974_s3 + $0x18] sm:$0xff] }
  0x37   :  { %v80_v22 = vrot.slane %v79_v19, 4  ;;  %v122_v26 = vmul.f32 %v121_v20, %v121_v20  ;;  %v146_v27 = vmul.f32 %v145_v21, %v145_v21  ;;  %v98_v36 = vmul.f32 %v97_v29, %v97_v29 }
  0x38   :  { %v821_v21 = vunpack.c.h.bf16 %v594_v16  ;;  %v841_v29 = vunpack.c.h.bf16 %v583_v10 }
  0x39   :  { %v81_v25 = vmax.f32 %v79_v19, %v80_v22  ;;  %v123_v33 = vmul.f32 -0.00014109348, %v122_v26  ;;  %v147_v34 = vmul.f32 -0.00014109348, %v146_v27  ;;  %v99_v41 = vmul.f32 -0.00014109348, %v98_v36 }
  0x3b   :  { %v82_v28 = vrot.slane %v81_v25, 2  ;;  %v124_v38 = vadd.f32 0.0031746032, %v123_v33  ;;  %v148_v39 = vadd.f32 0.0031746032, %v147_v34 }
  0x3c   :  { %v100_v46 = vadd.f32 0.0031746032, %v99_v41 }
  0x3d   :  { %v83_v32 = vmax.f32 %v81_v25, %v82_v28  ;;  %v125_v43 = vmul.f32 %v124_v38, %v122_v26  ;;  %v149_v44 = vmul.f32 %v148_v39, %v146_v27 }
  0x3e   :  { %v101_v51 = vmul.f32 %v100_v46, %v98_v36 }
  0x3f   :  { %v84_v35 = vrot.slane %v83_v32, 1  ;;  %v126_v48 = vadd.f32 -0.044444446, %v125_v43  ;;  %v150_v49 = vadd.f32 -0.044444446, %v149_v44 }
  0x40   :  { %v102_v56 = vadd.f32 -0.044444446, %v101_v51 }
  0x41   :  { %v85_v37 = vmax.f32 %v83_v32, %v84_v35  ;;  %v127_v53 = vmul.f32 %v126_v48, %v122_v26  ;;  %v151_v54 = vmul.f32 %v150_v49, %v146_v27 }
  0x42   :  { %v103_v62 = vmul.f32 %v102_v56, %v98_v36  ;;  %v174_v56 = vld [vmem:[%s974_s3 + $0x28] sm:$0xff] }
  0x43   :  { %v86_v40 = vmul.f32 1.1, %v85_v37  ;;  %v128_v58 = vadd.f32 0.33333334, %v127_v53  ;;  %v152_v59 = vadd.f32 0.33333334, %v151_v54 }
  0x44   :  { %v104_v2 = vadd.f32 0.33333334, %v103_v62  ;;  %v169_v54 = vld [vmem:[%s974_s3] sm:$0xff] }
  0x45   :  { %v87_v42 = vsub.f32 %v86_v40, %v79_v19  ;;  %v129_v61 = vmul.f32 %v128_v58, %v122_v26  ;;  %v153_v63 = vmul.f32 %v152_v59, %v146_v27  ;;  %v175_v58 = vld [vmem:[%s974_s3 + $0x30] sm:$0xff]  ;;  %v308_v59 = vld [vmem:[%s977_s6] sm:$0xff] }
  0x46   :  { %v105_v8 = vmul.f32 %v104_v2, %v98_v36  ;;  %616 = vmatprep.mubr.msk.f32.mxu1 %vm312_vm4, %v308_v59 }
  0x47   :  { %v88_v45 = vmul.f32 %v87_v42, %v87_v42  ;;  %v130_v1 = vadd.f32 -1.0, %v129_v61  ;;  %v154_v6 = vadd.f32 -1.0, %v153_v63 }
  0x48   :  { %v106_v12 = vadd.f32 -1.0, %v105_v8 }
  0x49   :  { %v89_v47 = vrot.slane %v88_v45, 4  ;;  %v131_v7 = vmul.f32 %v130_v1, %v122_v26  ;;  %v155_v9 = vmul.f32 %v154_v6, %v146_v27  ;;  %v836_v26 = vunpack.c.l.bf16 %v594_v16 }
  0x4a   :  { %v107_v19 = vmul.f32 %v106_v12, %v98_v36 }
  0x4b   :  { %v90_v50 = vadd.f32 %v89_v47, %v88_v45  ;;  %v132_v11 = vadd.f32 1.0, %v131_v7  ;;  %v156_v13 = vadd.f32 1.0, %v155_v9 }
  0x4c   :  { %v108_v27 = vadd.f32 1.0, %v107_v19 }
  0x4d   :  { %v91_v52 = vrot.slane %v90_v50, 2 }
  0x4f   :  { %v92_v55 = vadd.f32 %v91_v52, %v90_v50 }
  0x51   :  { %v93_v57 = vrot.slane %v92_v55, 1 }
  0x53   :  { %v94_v60 = vadd.f32 %v93_v57, %v92_v55  ;;  %v171_v55 = vld [vmem:[%s974_s3 + $0x10] sm:$0xff]  ;;  %v176_v57 = vld [vmem:[%s974_s3 + $0x38] sm:$0xff] }
  0x55   :  { %643 = vrcp.f32 %v94_v60 }
  0x62   :  { %v644_v14 = vpop.eup %643 }
  0x63   :  { %v96_v15 = vmul.f32 %v644_v14, %v88_v45 }
  0x65   :  { %v819_v18 = vmul.f32 %v132_v11, %v96_v15  ;;  %v157_v20 = vmul.f32 %v156_v13, %v96_v15  ;;  %v109_v32 = vmul.f32 %v108_v27, %v96_v15  ;;  %v306_v27 = vld [vmem:[%s976_s5 + $0x18] sm:$0xff] }
  0x67   :  { %v826_v22 = vsel %vm134_vm1, %v819_v18, 0.0  ;;  %v830_v23 = vsel %vm158_vm2, %v157_v20, 0.0  ;;  %v111_v35 = vsel %vm110_vm3, %v109_v32, 0.0 }
  0x68   :  { %v141_v24 = vmul.f32 %v815_v17, %v826_v22  ;;  %v136_v25 = vsub.f32 %v819_v18, %v826_v22  ;;  %v839_v28 = vsub.f32 %v157_v20, %v830_v23  ;;  %v120_v36 = vmul.f32 %v821_v21, %v111_v35 }
  0x69   :  { %v119_v37 = vmul.f32 %v836_v26, %v111_v35  ;;  %v118_v3 = vmul.f32 %v841_v29, %v111_v35  ;;  %v112_v38 = vsub.f32 %v109_v32, %v111_v35  ;;  %v117_v39 = vmul.f32 %v815_v17, %v111_v35 }
  0x6a   :  { %215 = vmatpush1.msra.mxu0 %v141_v24  ;;  %v140_v30 = vmul.f32 %v821_v21, %v136_v25  ;;  %v139_v31 = vmul.f32 %v836_v26, %v136_v25  ;;  %v138_v33 = vmul.f32 %v841_v29, %v136_v25  ;;  %v137_v34 = vmul.f32 %v815_v17, %v136_v25  ;;  %v303_v24 = vld [vmem:[%s976_s5] sm:$0xff] }
  0x6b   :  { %216 = vmatprep.subr.mxu0 %v715_v0  ;;  %v116_v40 = vmul.f32 %v821_v21, %v112_v38  ;;  %v115_v41 = vmul.f32 %v836_v26, %v112_v38  ;;  %v114_v42 = vmul.f32 %v841_v29, %v112_v38  ;;  %v113_v43 = vmul.f32 %v815_v17, %v112_v38 }
  0x6c   :  { %217 = vmatpush1.msra.mxu0 %v136_v25  ;;  %v168_v44 = vmul.f32 %v821_v21, %v830_v23  ;;  %v167_v45 = vmul.f32 %v836_v26, %v830_v23  ;;  %v166_v46 = vmul.f32 %v841_v29, %v830_v23  ;;  %v165_v47 = vmul.f32 %v815_v17, %v830_v23  ;;  %v311_v23 = vld [vmem:[%s977_s6 + $0x18] sm:$0xff]  ;;  %v304_v25 = vld [vmem:[%s976_s5 + $0x8] sm:$0xff] }
  0x6d   :  { %218 = vmatprep.subr.mxu0 %v715_v0  ;;  %v164_v5 = vmul.f32 %v821_v21, %v839_v28  ;;  %v163_v48 = vmul.f32 %v836_v26, %v839_v28  ;;  %v162_v49 = vmul.f32 %v841_v29, %v839_v28  ;;  %v161_v50 = vmul.f32 %v815_v17, %v839_v28 }
  0x6e   :  { %219 = vmatpush1.msra.mxu0 %v140_v30  ;;  %v144_v51 = vmul.f32 %v821_v21, %v826_v22  ;;  %v143_v52 = vmul.f32 %v836_v26, %v826_v22  ;;  %v142_v53 = vmul.f32 %v841_v29, %v826_v22  ;;  %v307_v21 = vld [vmem:[%s973_s2] sm:$0xf]  ;;  %v310_v22 = vld [vmem:[%s977_s6 + $0x10] sm:$0xff] }
  0x6f   :  { %220 = vmatprep.subr.mxu0 %v715_v0  ;;  %v305_v26 = vld [vmem:[%s976_s5 + $0x10] sm:$0xff]  ;;  %s717_s5 = smov [#allocation7]  }
  0x70   :  { %221 = vmatpush1.msra.mxu0 %v139_v31  ;;  %s553_s12 = sshll.u32 %s717_s5, 4  ;;  %s554_s12 = int_to_ptr.vmem [resolvable:$true] %s553_s12 }
  0x71   :  { %222 = vmatprep.subr.mxu0 %v715_v0  ;;  %s685_s13 = scalar_lea.vmem %s554_s12, 512  ;;  %p690_p11 = scmp.lt.s32.totalorder %s554_s12, %s554_s12 }
  0x72   :  { %223 = vmatpush1.msra.mxu0 %v138_v33  ;;  %p686_p10 = scmp.ne.s32.totalorder %s554_s12, %s685_s13  ;;  %p691_p12 = scmp.lt.s32.totalorder %s685_s13, %s685_s13 }
  0x73   :  { %224 = vmatprep.subr.mxu0 %v715_v0 }
  0x74   :  { %225 = vmatpush1.msra.mxu0 %v137_v34  ;;  %p692_p13 = por %p691_p12, %p690_p11 }
  0x75   :  { %226 = vmatprep.subr.mxu0 %v715_v0 }
  0x76   :  { %566 = vmatpush1.msk.msra.mxu0 %vm110_vm3, %v109_v32  ;;  %p693_p0 = pnand %p692_p13, %p686_p10 }
  0x77   :  { %228 = vmatprep.subr.mxu0 %v715_v0 }
  0x78   :  { %229 = vmatpush1.msra.mxu0 %v120_v36 }
  0x79   :  { %230 = vmatprep.subr.mxu0 %v715_v0 }
  0x7a   :  { %231 = vmatpush1.msra.mxu0 %v119_v37 }
  0x7b   :  { %232 = vmatprep.subr.mxu0 %v715_v0 }
  0x7c   :  { %233 = vmatpush1.msra.mxu0 %v118_v3 }
  0x7d   :  { %234 = vmatprep.subr.mxu0 %v715_v0 }
  0x7e   :  { %235 = vmatpush1.msra.mxu0 %v117_v39 }
  0x7f   :  { %236 = vmatprep.subr.mxu0 %v715_v0 }
  0x80   :  { %237 = vmatpush1.msra.mxu0 %v112_v38 }
  0x81   :  { %238 = vmatprep.subr.mxu0 %v715_v0 }
  0x82   :  { %239 = vmatpush1.msra.mxu0 %v116_v40 }
  0x83   :  { %240 = vmatprep.subr.mxu0 %v715_v0 }
  0x84   :  { %241 = vmatpush1.msra.mxu0 %v115_v41 }
  0x85   :  { %242 = vmatprep.subr.mxu0 %v715_v0 }
  0x86   :  { %243 = vmatpush1.msra.mxu0 %v114_v42 }
  0x87   :  { %244 = vmatprep.subr.mxu0 %v715_v0 }
  0x88   :  { %245 = vmatpush1.msra.mxu0 %v113_v43 }
  0x89   :  { %250 = vmatprep.subr.mxu0 %v715_v0 }
  0x8a   :  { %567 = vmatpush2.msk.msra.mxu0 %vm158_vm2, %v157_v20  ;;  %v309_v20 = vld [vmem:[%s977_s6 + $0x8] sm:$0xff] }
  0x8b   :  { %252 = vmatprep.subr.mxu0 %v715_v0 }
  0x8c   :  { %253 = vmatpush2.msra.mxu0 %v168_v44 }
  0x8d   :  { %254 = vmatprep.subr.mxu0 %v715_v0 }
  0x8e   :  { %255 = vmatpush2.msra.mxu0 %v167_v45 }
  0x8f   :  { %256 = vmatprep.subr.mxu0 %v715_v0 }
  0x90   :  { %257 = vmatpush2.msra.mxu0 %v166_v46 }
  0x91   :  { %258 = vmatprep.subr.mxu0 %v715_v0 }
  0x92   :  { %259 = vmatpush2.msra.mxu0 %v165_v47 }
  0x93   :  { %260 = vmatprep.subr.mxu0 %v715_v0 }
  0x94   :  { %261 = vmatpush2.msra.mxu0 %v839_v28 }
  0x95   :  { %262 = vmatprep.subr.mxu0 %v715_v0 }
  0x96   :  { %263 = vmatpush2.msra.mxu0 %v164_v5 }
  0x97   :  { %264 = vmatprep.subr.mxu0 %v715_v0 }
  0x98   :  { %265 = vmatpush2.msra.mxu0 %v163_v48 }
  0x99   :  { %266 = vmatprep.subr.mxu0 %v715_v0 }
  0x9a   :  { %267 = vmatpush2.msra.mxu0 %v162_v49 }
  0x9b   :  { %268 = vmatprep.subr.mxu0 %v715_v0  ;;  %v199_v63 = vpop.permute.xlu0 %198  ;;  %v189_v2 = vpop.permute.xlu1 %188 }
  0x9c   :  { %269 = vmatpush2.msra.mxu0 %v161_v50 }
  0x9d   :  { %270 = vmatprep.subr.mxu0 %v715_v0 }
  0x9e   :  { %568 = vmatpush2.msk.msra.mxu0 %vm134_vm1, %v819_v18 }
  0x9f   :  { %272 = vmatprep.subr.mxu0 %v715_v0  ;;  %v194_v8 = vpop.permute.xlu0 %193  ;;  %v184_v12 = vpop.permute.xlu1 %183 }
  0xa0   :  { %273 = vmatpush2.msra.mxu0 %v144_v51 }
  0xa1   :  { %274 = vmatprep.subr.mxu0 %v715_v0 }
  0xa2   :  { %275 = vmatpush2.msra.mxu0 %v143_v52 }
  0xa3   :  { %276 = vmatprep.subr.mxu0 %v715_v0  ;;  %v173_v0 = vld [vmem:[%s974_s3 + $0x20] sm:$0xff]  ;;  %v524_v32 = vpop.permute.xlu1 %523  ;;  %v519_v35 = vpop.permute.xlu0 %518 }
  0xa4   :  { %277 = vmatpush2.msra.mxu0 %v142_v53 }
  0xa5   :  { %279 = vmatmul.mubr.f32.vlgmr.msra.gmra.mxu0 %v169_v54 }
  0xa6   :  { %570 = vmatprep.mubr.msk.f32.mxu0 %vm201_vm0, %v172_v4 }
  0xa7   :  { %v534_v42 = vpop.permute.xlu1 %533  ;;  %v529_v47 = vpop.permute.xlu0 %528 }
  0xa9   :  { %284 = vmatmul.mubr.f32.gmra.mxu0 %v171_v55 }
  0xaa   :  { %571 = vmatprep.mubr.msk.f32.mxu0 %vm201_vm0, %v174_v56 }
  0xad   :  { %289 = vmatmul.mubr.f32.gmra.mxu0 %v173_v0 }
  0xae   :  { %572 = vmatprep.mubr.msk.f32.mxu0 %vm201_vm0, %v176_v57 }
  0xb1   :  { %294 = vmatmul.mubr.f32.gmra.mxu0 %v175_v58 }
 0x165   :  { %v280_v60 = vpop.f32.mrf.mxu0 }
 0x166   :  { %v281_v16 = vadd.f32 %v280_v60, %v184_v12 }
 0x167   :  { %v282_v61 = vpop.f32.mrf.mxu0 }
 0x168   :  { %v299_v19 = vmax.f32 %v281_v16, 0.0 }
 0x169   :  { %v285_v62 = vpop.f32.mrf.mxu0 }
 0x16a   :  { %v286_v14 = vadd.f32 %v285_v62, %v189_v2 }
 0x16b   :  { %v287_v1 = vpop.f32.mrf.mxu0 }
 0x16c   :  { %v300_v18 = vmax.f32 %v286_v14, 0.0 }
 0x16d   :  { %v290_v6 = vpop.f32.mrf.mxu0 }
 0x16e   :  { %v291_v10 = vadd.f32 %v290_v6, %v194_v8 }
 0x16f   :  { %v292_v7 = vpop.f32.mrf.mxu0 }
 0x170   :  { %v301_v17 = vmax.f32 %v291_v10, 0.0 }
 0x171   :  { %v295_v9 = vpop.f32.mrf.mxu0 }
 0x172   :  { %v296_v11 = vadd.f32 %v295_v9, %v199_v63 }
 0x173   :  { %v297_v13 = vpop.f32.mrf.mxu0 }
 0x174   :  { %v302_v15 = vmax.f32 %v296_v11, 0.0 }
 0x176   :  { %608 = vmatprep.subr.mxu1 %v302_v15 }
 0x177   :  { %609 = vmatpush3.msra.mxu1 %v302_v15 }
 0x178   :  { %610 = vmatprep.subr.mxu1 %v301_v17 }
 0x179   :  { %611 = vmatpush3.msra.mxu1 %v301_v17 }
 0x17a   :  { %612 = vmatprep.subr.mxu1 %v300_v18 }
 0x17b   :  { %613 = vmatpush3.msra.mxu1 %v300_v18 }
 0x17c   :  { %614 = vmatprep.subr.mxu1 %v299_v19 }
 0x17d   :  { %615 = vmatpush3.msra.mxu1 %v299_v19 }
 0x17e   :  { %617 = vmatmul.mubr.msk.f32.vlgmr.msra.gmra.mxu1 %vm312_vm4, %v309_v20  ;;  %622 = vmatprep.subr.msk.mxu1 %vm423_vm5, %v307_v21 }
 0x17f   :  { %623 = vmatpush3.msk.msra.mxu1 %vm423_vm5, %v307_v21  ;;  %619 = vmatprep.mubr.msk.f32.mxu1 %vm312_vm4, %v310_v22 }
 0x182   :  { %620 = vmatmul.mubr.msk.f32.gmra.mxu1 %vm312_vm4, %v311_v23 }
 0x183   :  { %624 = vmatprep.mubr.msk.f32.mxu1 %vm410_vm6, %v303_v24 }
 0x186   :  { %625 = vmatmul.mubr.msk.f32.vlgmr.msra.gmra.mxu1 %vm410_vm6, %v304_v25 }
 0x187   :  { %627 = vmatprep.mubr.msk.f32.mxu1 %vm410_vm6, %v305_v26 }
 0x18a   :  { %628 = vmatmul.mubr.msk.f32.gmra.mxu1 %vm410_vm6, %v306_v27 }
 0x23e   :  { %v618_v28 = vpop.f32.mrf.mxu1 }
 0x240   :  { %v391_v29 = vpop.f32.mrf.mxu1 }
 0x242   :  { %v621_v30 = vpop.f32.mrf.mxu1 }
 0x244   :  { %v401_v31 = vpop.f32.mrf.mxu1 }
 0x246   :  { %v626_v33 = vpop.f32.mrf.mxu1 }
 0x247   :  { %v499_v34 = vadd.f32 %v626_v33, %v618_v28 }
 0x248   :  { %v493_v36 = vpop.f32.mrf.mxu1 }
 0x249   :  { %v537_v37 = vadd.f32 %v524_v32, %v499_v34  ;;  %v494_v3 = vadd.f32 %v493_v36, %v391_v29 }
 0x24a   :  { %v629_v38 = vpop.f32.mrf.mxu1 }
 0x24b   :  { %v541_v39 = vmax.f32 %v537_v37, 0.0  ;;  %v536_v40 = vadd.f32 %v519_v35, %v494_v3  ;;  %v509_v41 = vadd.f32 %v629_v38, %v621_v30 }
 0x24c   :  { %v503_v43 = vpop.f32.mrf.mxu1 }
 0x24d   :  { %545 = vst [vmem:[#allocation7 + $0x8] sm:$0xff] %v541_v39  ;;  %v540_v44 = vmax.f32 %v536_v40, 0.0  ;;  %v539_v45 = vadd.f32 %v534_v42, %v509_v41  ;;  %v504_v46 = vadd.f32 %v503_v43, %v401_v31 }
 0x24f   :  { %544 = vst [vmem:[#allocation7] sm:$0xff] %v540_v44  ;;  %v543_v5 = vmax.f32 %v539_v45, 0.0  ;;  %v538_v48 = vadd.f32 %v529_v47, %v504_v46 }
 0x251   :  { %547 = vst [vmem:[#allocation7 + $0x18] sm:$0xff] %v543_v5  ;;  %v542_v49 = vmax.f32 %v538_v48, 0.0 }
 0x253   :  { %546 = vst [vmem:[#allocation7 + $0x10] sm:$0xff] %v542_v49 }
 0x254   :  { %696 = shalt.err (!%p693_p0)
}
 0x255   :  { %s718_s14 = smov 128   ;;  %s719_s15 = smov 8  }
 0x256   :  { %559 = dma.vmem_to_hbm [thread:$0]  %s554_s12, 512, %s979_s8, [#allocation4], %s718_s14, %s718_s14, %s719_s15  }
 0x257   :  { %709 = dma.done.wait [#allocation4], 512  }
 0x258   :  { %710 = vsyncadd [#allocation4], 4294966784 }
 0x259   :  { %563 = vsyncpa [#allocation3], 1 }
 0x25a   :  { %564 = vsyncpa [#allocation6], 1 }
 0x25b   :  { %565 = vsyncpa [#allocation4], 1 }

</bundles_post_ra>
